<compile_context>
chip_gen: v5e
topology: v5e:2x2
jax: 0.10.0
libtpu: 0.0.40
codegen_flags: <defaults>
</compile_context>

<pallas_src>
import jax
import jax.numpy as jnp
from jax import lax
from jax.experimental import pallas as pl
from jax.experimental.pallas import tpu as pltpu


def _round_up(v, m):
    return ((v + m - 1) // m) * m


def residual_add_kernel(x_ref, w_ref, b_ref, o_ref):
    """out_tile = x_tile @ W^T + b + x_tile.

    x_ref: (TM, H)   row tile of the flattened (batch*seq, hidden) input
    w_ref: (H, H)    PyTorch Linear weight (out_features, in_features), VMEM-resident
    b_ref: (1, H)    bias, f32
    o_ref: (TM, H)
    """
    x = x_ref[...]
    # Contract along the in_features axis of BOTH operands -> no host-side W.T.
    y = lax.dot_general(
        x, w_ref[...],
        dimension_numbers=(((1,), (1,)), ((), ())),
        preferred_element_type=jnp.float32)
    y = y + b_ref[...]                                     # f32 epilogue (bias)
    o_ref[...] = (y + x.astype(jnp.float32)).astype(o_ref.dtype)   # residual add


def residual_add_linear(x, weight, bias, *, tm=256):
    """ResidualAdd(Linear): out = x @ weight.T + bias + x.

    x:      (batch, seq, hidden)
    weight: (hidden, hidden)  -- PyTorch Linear convention (out_features, in_features)
    bias:   (hidden,)
    """
    B, S, H = x.shape
    M = B * S
    x2d = x.reshape(M, H)

    w = weight.astype(x.dtype)     # MXU operands follow the activation dtype
    b = bias.astype(jnp.float32)   # epilogue stays f32 on every TPU generation

    # Lane-dense last dim: pad hidden up to a multiple of 128 (zero pads are inert:
    # padded in_features contribute 0 to the dot, padded out columns are sliced off).
    Hp = _round_up(H, 128)
    if Hp != H:
        x2d = jnp.pad(x2d, ((0, 0), (0, Hp - H)))
        w = jnp.pad(w, ((0, Hp - H), (0, Hp - H)))
        b = jnp.pad(b, (0, Hp - H))
    b2d = b.reshape(1, Hp)

    # Row tile: whole M for tiny inputs, otherwise a 256-row tile (8-sublane aligned).
    tm = M if M <= tm else tm
    grid_m = pl.cdiv(M, tm)

    itemsize = jnp.dtype(x.dtype).itemsize
    # double-buffered x/out tiles + resident weight + bias + f32 matmul result
    vmem_needed = (2 * 2 * tm * Hp * itemsize
                   + Hp * Hp * itemsize
                   + Hp * 4
                   + tm * Hp * 4)
    vmem_limit = int(min(max(2 * vmem_needed, 16 * 1024 * 1024),
                         64 * 1024 * 1024))

    cost = pl.CostEstimate(
        flops=2 * M * Hp * Hp,
        transcendentals=0,
        bytes_accessed=(2 * M * Hp * itemsize        # x read + out write
                        + Hp * Hp * itemsize         # weight (read once)
                        + Hp * 4),                   # bias
    )

    out = pl.pallas_call(
        residual_add_kernel,
        out_shape=jax.ShapeDtypeStruct((M, Hp), x.dtype),
        grid_spec=pl.GridSpec(
            grid=(grid_m,),
            in_specs=[
                pl.BlockSpec((tm, Hp), lambda i: (i, 0)),   # x: tiled over rows
                pl.BlockSpec((Hp, Hp), lambda i: (0, 0)),   # W: VMEM-resident
                pl.BlockSpec((1, Hp), lambda i: (0, 0)),    # bias: VMEM-resident
            ],
            out_specs=pl.BlockSpec((tm, Hp), lambda i: (i, 0)),
        ),
        compiler_params=pltpu.CompilerParams(
            dimension_semantics=("parallel",),   # shard row tiles across v7x's 2 TCs
            vmem_limit_bytes=vmem_limit,
        ),
        cost_estimate=cost,
    )(x2d, w, b2d)

    if Hp != H:
        out = out[:, :H]
    return out.reshape(B, S, H)


if __name__ == "__main__":
    key = jax.random.PRNGKey(0)
    k_x, k_w, k_b = jax.random.split(key, 3)

    batch, seq, hidden = 2, 8, 32
    x = jax.random.normal(k_x, (batch, seq, hidden), dtype=jnp.float32)
    # Deterministic "Linear" parameters (PyTorch shape conventions).
    weight = jax.random.normal(k_w, (hidden, hidden), dtype=jnp.float32) * 0.05
    bias = jax.random.normal(k_b, (hidden,), dtype=jnp.float32) * 0.05

    out = residual_add_linear(x, weight, bias)
    jax.block_until_ready(out)

    # Reference check (plain JAX): fn(x) + x
    ref = x @ weight.T + bias + x
    assert jnp.allclose(out, ref, atol=1e-5, rtol=1e-5), "mismatch vs reference"

    print("KERNEL_OK")
</pallas_src>

<mosaic_0001>
module attributes {stable_mosaic.version = 11 : i64} {
  func.func @residual_add_kernel(%arg0: i32, %arg1: memref<16x128xf32, #tpu.memory_space<vmem>>, %arg2: memref<128x128xf32, #tpu.memory_space<vmem>>, %arg3: memref<1x128xf32, #tpu.memory_space<vmem>>, %arg4: memref<16x128xf32, #tpu.memory_space<vmem>>) attributes {dimension_semantics = [#tpu.dimension_semantics<parallel>], iteration_bounds = array<i64: 1>, scalar_prefetch = 0 : i64, scratch_operands = 0 : i64, tpu.core_type = #tpu.core_type<tc>, window_params = [{transform_indices = @transform_0, window_bounds = array<i64: 16, 128>}, {pipeline_mode = #tpu.pipeline_mode<synchronous>, transform_indices = @transform_1, window_bounds = array<i64: 128, 128>}, {pipeline_mode = #tpu.pipeline_mode<synchronous>, transform_indices = @transform_2, window_bounds = array<i64: 1, 128>}, {transform_indices = @transform_3, window_bounds = array<i64: 16, 128>}]} {
    %c0 = arith.constant 0 : index
    %c0_0 = arith.constant 0 : index
    %0 = vector.load %arg1[%c0, %c0_0] : memref<16x128xf32, #tpu.memory_space<vmem>>, vector<16x128xf32>
    %c0_1 = arith.constant 0 : index
    %c0_2 = arith.constant 0 : index
    %1 = vector.load %arg2[%c0_1, %c0_2] : memref<128x128xf32, #tpu.memory_space<vmem>>, vector<128x128xf32>
    %cst = arith.constant dense<0.000000e+00> : vector<16x128xf32>
    %2 = tpu.matmul %0, %1, %cst {dimension_numbers = #tpu.dot_dimension_numbers<[1], [1], [0], [0], [0, 0, 1, 0], [], []>} : vector<16x128xf32>, vector<128x128xf32>, vector<16x128xf32> -> vector<16x128xf32>
    %c0_3 = arith.constant 0 : index
    %c0_4 = arith.constant 0 : index
    %3 = vector.load %arg3[%c0_3, %c0_4] : memref<1x128xf32, #tpu.memory_space<vmem>>, vector<1x128xf32>
    %4 = vector.broadcast %3 : vector<1x128xf32> to vector<16x128xf32>
    %5 = arith.addf %2, %4 : vector<16x128xf32>
    %6 = arith.addf %5, %0 : vector<16x128xf32>
    %c0_5 = arith.constant 0 : index
    %c0_6 = arith.constant 0 : index
    %7 = vector.load %arg4[%c0_5, %c0_6] : memref<16x128xf32, #tpu.memory_space<vmem>>, vector<16x128xf32>
    tpu.vector_store %arg4[%c0_5, %c0_6], %6 {strides = array<i32>} : memref<16x128xf32, #tpu.memory_space<vmem>>, vector<16x128xf32>,
    return
  }
  func.func @transform_0(%arg0: i32) -> (i32, i32) {
    %c0_i32 = arith.constant 0 : i32
    %c0_i32_0 = arith.constant 0 : i32
    return %arg0, %c0_i32 : i32, i32
  }
  func.func @transform_1(%arg0: i32) -> (i32, i32) {
    %c0_i32 = arith.constant 0 : i32
    %c0_i32_0 = arith.constant 0 : i32
    %c0_i32_1 = arith.constant 0 : i32
    return %c0_i32, %c0_i32_0 : i32, i32
  }
  func.func @transform_2(%arg0: i32) -> (i32, i32) {
    %c0_i32 = arith.constant 0 : i32
    %c0_i32_0 = arith.constant 0 : i32
    %c0_i32_1 = arith.constant 0 : i32
    return %c0_i32, %c0_i32_0 : i32, i32
  }
  func.func @transform_3(%arg0: i32) -> (i32, i32) {
    %c0_i32 = arith.constant 0 : i32
    %c0_i32_0 = arith.constant 0 : i32
    return %arg0, %c0_i32 : i32, i32
  }
}

</mosaic_0001>

<bundles_post_ra>
// kernel: tpu_custom_call.1
= control target key start
LH: loop header
LB: loop body
LE: loop exit
PB: predicated region body
PF: predicated region fallthrough
CT: control target
= control target key end

     0   :  { %8 = vsyncpa [#allocation3], 0  ;;  %s262_s0 = inlined_call_operand.hbm [shape: f32[16,128], index: 0, kind: input, shape index: {}]   ;;  %s263_s1 = inlined_call_operand.hbm [shape: f32[128,128], index: 1, kind: input, shape index: {}]   ;;  %s264_s2 = inlined_call_operand.vmem [shape: f32[1,128], index: 2, kind: input, shape index: {}]   ;;  %s265_s3 = inlined_call_operand.hbm [shape: f32[16,128], index: 3, kind: output, shape index: {}]  }
   0x1   :  { %9 = vsyncpa [#allocation6], 0 }
   0x2   :  { %10 = vsyncpa [#allocation4], 0  ;;  %s15_s14 = sshll.u32 %s262_s0, 4  ;;  %s216_s15 = smov [#allocation2]   ;;  %s16_s14 = int_to_ptr.hbm [resolvable:$true] %s15_s14 }
   0x3   :  { %s17_s16 = sshll.u32 %s216_s15, 4  ;;  %s28_s19 = sshll.u32 %s263_s1, 4  ;;  %s18_s16 = int_to_ptr.vmem [resolvable:$true] %s17_s16  ;;  %s29_s19 = int_to_ptr.hbm [resolvable:$true] %s28_s19 }
   0x4   :  { %s217_s20 = smov 128   ;;  %s218_s21 = smov 8  }
   0x5   :  { %23 = dma.hbm_to_vmem [thread:$0]  %s16_s14, 256, %s18_s16, [#allocation3], %s217_s20, %s217_s20, %s218_s21  }
   0x6   :  { %s219_s22 = smov [#allocation5]  }
   0x7   :  { %s30_s23 = sshll.u32 %s219_s22, 4  ;;  %s31_s23 = int_to_ptr.vmem [resolvable:$true] %s30_s23 }
   0x8   :  { %36 = dma.hbm_to_vmem [thread:$0]  %s29_s19, 2048, %s31_s23, [#allocation6], %s217_s20, %s217_s20, %s218_s21  }
   0x9   :  { %210 = dma.done.wait [#allocation3], 256  }
   0xa   :  { %211 = vsyncadd [#allocation3], 4294967040 }
   0xb   :  { %212 = dma.done.wait [#allocation6], 2048  }
   0xc   :  { %213 = vsyncadd [#allocation6], 4294965248  ;;  %v64_v0 = vld [vmem:[#allocation5 + $0x78] sm:$0xff]  ;;  %v63_v1 = vld [vmem:[#allocation5 + $0x70] sm:$0xff]  ;;  %s220_s24 = smov [#allocation7]   ;;  %s102_s28 = sshll.u32 %s265_s3, 4  ;;  %s103_s28 = int_to_ptr.hbm [resolvable:$true] %s102_s28 }
   0xd   :  { %69 = vmatpush.xpose.msra.mxu0 %v64_v0  ;;  %116 = vmatpush.xpose.msra.mxu1 %v64_v0  ;;  %v62_v2 = vld [vmem:[#allocation5 + $0x68] sm:$0xff]  ;;  %v61_v3 = vld [vmem:[#allocation5 + $0x60] sm:$0xff]  ;;  %v60_v4 = vld [vmem:[#allocation5 + $0x58] sm:$0xff]  ;;  %s100_s25 = sshll.u32 %s220_s24, 4  ;;  %s101_s25 = int_to_ptr.vmem [resolvable:$true] %s100_s25 }
   0xe   :  { %v59_v5 = vld [vmem:[#allocation5 + $0x50] sm:$0xff]  ;;  %v58_v6 = vld [vmem:[#allocation5 + $0x48] sm:$0xff]  ;;  %v57_v7 = vld [vmem:[#allocation5 + $0x40] sm:$0xff] }
   0xf   :  { %v56_v8 = vld [vmem:[#allocation5 + $0x38] sm:$0xff]  ;;  %v55_v9 = vld [vmem:[#allocation5 + $0x30] sm:$0xff]  ;;  %v54_v10 = vld [vmem:[#allocation5 + $0x28] sm:$0xff] }
  0x10   :  { %v53_v11 = vld [vmem:[#allocation5 + $0x20] sm:$0xff]  ;;  %v52_v12 = vld [vmem:[#allocation5 + $0x18] sm:$0xff]  ;;  %v51_v13 = vld [vmem:[#allocation5 + $0x10] sm:$0xff] }
  0x11   :  { %70 = vmatpush.xpose.msra.mxu0 %v63_v1  ;;  %117 = vmatpush.xpose.msra.mxu1 %v63_v1  ;;  %v50_v14 = vld [vmem:[#allocation5 + $0x8] sm:$0xff]  ;;  %v49_v15 = vld [vmem:[#allocation5] sm:$0xff]  ;;  %v47_v16 = vld [vmem:[#allocation2] sm:$0xff] }
  0x12   :  { %v48_v17 = vld [vmem:[#allocation2 + $0x8] sm:$0xff]  ;;  %v137_v18 = vld [vmem:[%s264_s2] ss:$0 sm:$0xff] }
  0x15   :  { %71 = vmatpush.xpose.msra.mxu0 %v62_v2  ;;  %118 = vmatpush.xpose.msra.mxu1 %v62_v2 }
  0x19   :  { %72 = vmatpush.xpose.msra.mxu0 %v61_v3  ;;  %119 = vmatpush.xpose.msra.mxu1 %v61_v3 }
  0x1d   :  { %73 = vmatpush.xpose.msra.mxu0 %v60_v4  ;;  %120 = vmatpush.xpose.msra.mxu1 %v60_v4 }
  0x21   :  { %74 = vmatpush.xpose.msra.mxu0 %v59_v5  ;;  %121 = vmatpush.xpose.msra.mxu1 %v59_v5 }
  0x25   :  { %75 = vmatpush.xpose.msra.mxu0 %v58_v6  ;;  %122 = vmatpush.xpose.msra.mxu1 %v58_v6 }
  0x29   :  { %76 = vmatpush.xpose.msra.mxu0 %v57_v7  ;;  %123 = vmatpush.xpose.msra.mxu1 %v57_v7 }
  0x2d   :  { %77 = vmatpush.xpose.msra.mxu0 %v56_v8  ;;  %124 = vmatpush.xpose.msra.mxu1 %v56_v8 }
  0x31   :  { %78 = vmatpush.xpose.msra.mxu0 %v55_v9  ;;  %125 = vmatpush.xpose.msra.mxu1 %v55_v9 }
  0x35   :  { %79 = vmatpush.xpose.msra.mxu0 %v54_v10  ;;  %126 = vmatpush.xpose.msra.mxu1 %v54_v10 }
  0x39   :  { %80 = vmatpush.xpose.msra.mxu0 %v53_v11  ;;  %127 = vmatpush.xpose.msra.mxu1 %v53_v11 }
  0x3d   :  { %81 = vmatpush.xpose.msra.mxu0 %v52_v12  ;;  %128 = vmatpush.xpose.msra.mxu1 %v52_v12 }
  0x41   :  { %82 = vmatpush.xpose.msra.mxu0 %v51_v13  ;;  %129 = vmatpush.xpose.msra.mxu1 %v51_v13 }
  0x45   :  { %83 = vmatpush.xpose.msra.mxu0 %v50_v14  ;;  %130 = vmatpush.xpose.msra.mxu1 %v50_v14 }
  0x49   :  { %84 = vmatpush.xpose.msra.mxu0 %v49_v15  ;;  %131 = vmatpush.xpose.msra.mxu1 %v49_v15 }
  0x4c   :  { %85 = vmatmul.f32.vlgmr.msra.gmra.mxu0 %v47_v16  ;;  %88 = vmatmul.f32.vlgmr.msra.gmra.mxu1 %v48_v17 }
  0xc9   :  { %v86_v19 = vpop.f32.mrf.mxu0  ;;  %v89_v20 = vpop.f32.mrf.mxu1 }
  0xca   :  { %v87_v21 = vadd.f32 %v137_v18, %v86_v19  ;;  %v90_v22 = vadd.f32 %v137_v18, %v89_v20 }
  0xcc   :  { %v92_v23 = vadd.f32 %v87_v21, %v47_v16  ;;  %v93_v24 = vadd.f32 %v90_v22, %v48_v17 }
  0xce   :  { %94 = vst [vmem:[#allocation7] sm:$0xff] %v92_v23 }
  0xcf   :  { %95 = vst [vmem:[#allocation7 + $0x8] sm:$0xff] %v93_v24 }
  0xd0   :  { %108 = dma.vmem_to_hbm [thread:$0]  %s101_s25, 256, %s103_s28, [#allocation4], %s217_s20, %s217_s20, %s218_s21  }
  0xd1   :  { %214 = dma.done.wait [#allocation4], 256  }
  0xd2   :  { %215 = vsyncadd [#allocation4], 4294967040 }
  0xd3   :  { %113 = vsyncpa [#allocation3], 1 }
  0xd4   :  { %114 = vsyncpa [#allocation6], 1 }
  0xd5   :  { %115 = vsyncpa [#allocation4], 1 }

</bundles_post_ra>
